<compile_context>
chip_gen: v7x
topology: tpu7x:2x2x1
jax: 0.10.0
libtpu: 0.0.40
codegen_flags: <defaults>
</compile_context>

<pallas_src>
import functools
import math

import jax
import jax.numpy as jnp
from jax.experimental import pallas as pl
from jax.experimental.pallas import tpu as pltpu

_LANE = 128       # feature tiles: multiple of 128 lanes (unmasked stores)
_SUBLANE = 8      # batch tiles: multiple of 8 sublanes
_TILE_B_MAX = 512
_TILE_S_MAX = 1024  # 512x1024 f32 tile = 2 MiB; ~8 MiB double-buffered (v7x-safe)


def _round_up(x, m):
    return ((x + m - 1) // m) * m


def _pick_tile(padded_dim, unit, max_tile):
    """Largest multiple of `unit` that divides `padded_dim` and is <= max_tile."""
    n = padded_dim // unit
    for d in range(min(n, max_tile // unit), 0, -1):
        if n % d == 0:
            return unit * d
    return unit


def _keep_mask(idx_ref, proj_ref):
    # Original: mask = int(sin((idx+199)*proj) * 1000 % 2)  in {0, 1}
    # Since mod(z, 2) = 2*frac(z/2) and the int-truncate of a value in [0,2) is
    # floor, mask == 1  <=>  frac(sin(arg) * 500) >= 0.5.
    # (idx + 199) is pre-added on the (B,1) column in the wrapper.
    arg = idx_ref[...] * proj_ref[...]            # (TB,1)*(1,TS) -> (TB,TS) f32
    y = jnp.sin(arg) * 500.0                      # sin on EUP; *500 == (*1000)/2
    return (y - jnp.floor(y)) >= 0.5              # bool keep-mask


def _tod_kernel(idx_ref, proj_ref, x_ref, o_ref, *, inv_scale, flip_all):
    keep = _keep_mask(idx_ref, proj_ref)
    if flip_all:                                  # static python bool (flips=True)
        keep = jnp.logical_not(keep)
    o_ref[...] = jnp.where(keep, x_ref[...] * inv_scale, 0.0).astype(o_ref.dtype)


def _tod_kernel_flips(idx_ref, flips_ref, proj_ref, x_ref, o_ref, *, inv_scale):
    keep = _keep_mask(idx_ref, proj_ref)
    flip = flips_ref[...] > 0.5                   # (TB,1) bool, broadcasts on lanes
    keep = jnp.logical_xor(keep, flip)            # == where(flip, 1-mask, mask)
    o_ref[...] = jnp.where(keep, x_ref[...] * inv_scale, 0.0).astype(o_ref.dtype)


class TurnOverDropout:
    """JAX/Pallas port of the PyTorch TurnOverDropout module."""

    def __init__(self, size: int, p: float = 0.5, seed: int = 777):
        self.size = int(size)
        self.p = float(p)
        self.seed = seed
        # TODO(synk): torch.rand's CPU generator stream has no JAX equivalent;
        # proj is reproduced with jax.random (same shape/range/semantics).
        key = jax.random.PRNGKey(seed)
        self.proj = (jax.random.uniform(key, (self.size,), dtype=jnp.float32) + 0.1) * 1000.0

    def __call__(self, x, indices=None, flips=None):
        if indices is None:
            assert flips is None
            return x

        S = self.size
        lead = tuple(indices.shape)
        B = int(math.prod(lead)) if lead else 1
        orig_shape = x.shape
        out_dtype = x.dtype

        x2 = x.reshape(B, S)                                   # native dtype, no upcast
        idx_col = indices.reshape(B, 1).astype(jnp.float32) + 199.0   # hoisted add
        proj_row = self.proj.reshape(1, S)

        # Pad to sublane/lane multiples so every tile is (8k, 128m) -> lane-dense stores.
        B_pad = _round_up(B, _SUBLANE)
        S_pad = _round_up(S, _LANE)
        padded = (B_pad != B) or (S_pad != S)
        if padded:
            x2 = jnp.pad(x2, ((0, B_pad - B), (0, S_pad - S)))
            idx_col = jnp.pad(idx_col, ((0, B_pad - B), (0, 0)))
            proj_row = jnp.pad(proj_row, ((0, 0), (0, S_pad - S)))

        tb = _pick_tile(B_pad, _SUBLANE, _TILE_B_MAX)
        ts = _pick_tile(S_pad, _LANE, _TILE_S_MAX)
        grid = (B_pad // tb, S_pad // ts)

        x_spec = pl.BlockSpec((tb, ts), lambda i, j: (i, j))
        col_spec = pl.BlockSpec((tb, 1), lambda i, j: (i, 0))   # idx / flips columns
        proj_spec = pl.BlockSpec((1, ts), lambda i, j: (0, j))
        out_spec = pl.BlockSpec((tb, ts), lambda i, j: (i, j))

        itemsize = jnp.dtype(out_dtype).itemsize
        cost = pl.CostEstimate(
            flops=4 * B_pad * S_pad,
            transcendentals=B_pad * S_pad,
            bytes_accessed=2 * B_pad * S_pad * itemsize + (2 * B_pad + S_pad) * 4,
        )
        cparams = pltpu.CompilerParams(dimension_semantics=("parallel", "parallel"))
        out_shape = jax.ShapeDtypeStruct((B_pad, S_pad), out_dtype)

        if flips is not None and not isinstance(flips, bool):
            flips_col = flips.reshape(B, 1).astype(jnp.float32)
            if B_pad != B:
                flips_col = jnp.pad(flips_col, ((0, B_pad - B), (0, 0)))
            kernel = functools.partial(_tod_kernel_flips, inv_scale=1.0 / (1.0 - self.p))
            out = pl.pallas_call(
                kernel,
                out_shape=out_shape,
                grid=grid,
                in_specs=[col_spec, col_spec, proj_spec, x_spec],
                out_specs=out_spec,
                compiler_params=cparams,
                cost_estimate=cost,
            )(idx_col, flips_col, proj_row, x2)
        else:
            if flips is None:
                inv_scale = 1.0 / self.p
                flip_all = False
            else:  # python bool
                inv_scale = 1.0 / (1.0 - self.p)
                flip_all = bool(flips)
            kernel = functools.partial(_tod_kernel, inv_scale=inv_scale, flip_all=flip_all)
            out = pl.pallas_call(
                kernel,
                out_shape=out_shape,
                grid=grid,
                in_specs=[col_spec, proj_spec, x_spec],
                out_specs=out_spec,
                compiler_params=cparams,
                cost_estimate=cost,
            )(idx_col, proj_row, x2)

        if padded:
            out = out[:B, :S]
        return out.reshape(orig_shape)


if __name__ == "__main__":
    B, SIZE = 8, 32  # seq=8, hidden=32
    p = 0.5

    key = jax.random.PRNGKey(0)
    kx, ki, kf = jax.random.split(key, 3)
    x = jax.random.normal(kx, (B, SIZE), dtype=jnp.float32)
    indices = jax.random.randint(ki, (B,), 0, 1000, dtype=jnp.int32)
    flips = jax.random.bernoulli(kf, 0.5, (B,))            # bool tensor
    flips_false = jnp.zeros((B,), dtype=bool)

    tod = TurnOverDropout(SIZE, p=p, seed=777)

    out_flips = jax.block_until_ready(tod(x, indices=indices, flips=flips))       # x*m/(1-p)
    out_noflip = jax.block_until_ready(tod(x, indices=indices, flips=None))       # x*m/p
    out_allfalse = jax.block_until_ready(tod(x, indices=indices, flips=flips_false))
    out_fliptrue = jax.block_until_ready(tod(x, indices=indices, flips=True))     # x*(1-m)/(1-p)
    out_id = jax.block_until_ready(tod(x))

    # Sanity: every output element is either 0 or the correspondingly scaled input.
    def check(out, scale):
        scaled = x * scale
        ok = jnp.all(jnp.minimum(jnp.abs(out), jnp.abs(out - scaled)) < 1e-5)
        assert bool(ok), "output elements must be 0 or x*scale"

    check(out_flips, 1.0 / (1.0 - p))
    check(out_noflip, 1.0 / p)
    check(out_allfalse, 1.0 / (1.0 - p))
    check(out_fliptrue, 1.0 / (1.0 - p))

    # mask + (1-mask) == 1  ->  complementary outputs sum to x/(1-p)
    assert bool(jnp.allclose(out_allfalse + out_fliptrue, x / (1.0 - p), atol=1e-4))
    # p == 0.5: flips=None and flips=all-False use the same scale and mask
    assert bool(jnp.allclose(out_noflip, out_allfalse, atol=1e-4))
    assert bool(jnp.all(out_id == x))
    assert out_flips.shape == x.shape and out_flips.dtype == x.dtype

    print("KERNEL_OK")
</pallas_src>

<mosaic_0001>
module attributes {stable_mosaic.version = 11 : i64} {
  func.func @_tod_kernel_flips(%arg0: i32, %arg1: i32, %arg2: memref<8x1xf32, #tpu.memory_space<vmem>>, %arg3: memref<8x1xf32, #tpu.memory_space<vmem>>, %arg4: memref<1x128xf32, #tpu.memory_space<vmem>>, %arg5: memref<8x128xf32, #tpu.memory_space<vmem>>, %arg6: memref<8x128xf32, #tpu.memory_space<vmem>>) attributes {dimension_semantics = [#tpu.dimension_semantics<parallel>, #tpu.dimension_semantics<parallel>], iteration_bounds = array<i64: 1, 1>, scalar_prefetch = 0 : i64, scratch_operands = 0 : i64, tpu.core_type = #tpu.core_type<tc>, window_params = [{transform_indices = @transform_0, window_bounds = array<i64: 8, 1>}, {transform_indices = @transform_1, window_bounds = array<i64: 8, 1>}, {transform_indices = @transform_2, window_bounds = array<i64: 1, 128>}, {transform_indices = @transform_3, window_bounds = array<i64: 8, 128>}, {transform_indices = @transform_4, window_bounds = array<i64: 8, 128>}]} {
    %c0 = arith.constant 0 : index
    %c0_0 = arith.constant 0 : index
    %0 = vector.load %arg2[%c0, %c0_0] : memref<8x1xf32, #tpu.memory_space<vmem>>, vector<8x1xf32>
    %c0_1 = arith.constant 0 : index
    %c0_2 = arith.constant 0 : index
    %1 = vector.load %arg4[%c0_1, %c0_2] : memref<1x128xf32, #tpu.memory_space<vmem>>, vector<1x128xf32>
    %2 = vector.broadcast %0 : vector<8x1xf32> to vector<8x128xf32>
    %3 = vector.broadcast %1 : vector<1x128xf32> to vector<8x128xf32>
    %4 = arith.mulf %2, %3 : vector<8x128xf32>
    %5 = math.sin %4 : vector<8x128xf32>
    %cst = arith.constant 5.000000e+02 : f32
    %6 = vector.broadcast %cst : f32 to vector<8x128xf32>
    %7 = arith.mulf %5, %6 : vector<8x128xf32>
    %8 = math.floor %7 : vector<8x128xf32>
    %9 = arith.subf %7, %8 : vector<8x128xf32>
    %cst_3 = arith.constant 5.000000e-01 : f32
    %10 = vector.broadcast %cst_3 : f32 to vector<8x128xf32>
    %11 = arith.cmpf oge, %9, %10 : vector<8x128xf32>
    %c0_4 = arith.constant 0 : index
    %c0_5 = arith.constant 0 : index
    %12 = vector.load %arg3[%c0_4, %c0_5] : memref<8x1xf32, #tpu.memory_space<vmem>>, vector<8x1xf32>
    %cst_6 = arith.constant 5.000000e-01 : f32
    %13 = vector.broadcast %cst_6 : f32 to vector<8x1xf32>
    %14 = arith.cmpf ogt, %12, %13 : vector<8x1xf32>
    %15 = vector.broadcast %14 : vector<8x1xi1> to vector<8x128xi1>
    %16 = arith.xori %11, %15 : vector<8x128xi1>
    %c0_7 = arith.constant 0 : index
    %c0_8 = arith.constant 0 : index
    %17 = vector.load %arg5[%c0_7, %c0_8] : memref<8x128xf32, #tpu.memory_space<vmem>>, vector<8x128xf32>
    %cst_9 = arith.constant 2.000000e+00 : f32
    %18 = vector.broadcast %cst_9 : f32 to vector<8x128xf32>
    %19 = arith.mulf %17, %18 : vector<8x128xf32>
    %cst_10 = arith.constant 0.000000e+00 : f32
    %20 = vector.broadcast %cst_10 : f32 to vector<8x128xf32>
    %21 = arith.select %16, %19, %20 : vector<8x128xi1>, vector<8x128xf32>
    %c0_11 = arith.constant 0 : index
    %c0_12 = arith.constant 0 : index
    %22 = vector.load %arg6[%c0_11, %c0_12] : memref<8x128xf32, #tpu.memory_space<vmem>>, vector<8x128xf32>
    tpu.vector_store %arg6[%c0_11, %c0_12], %21 {strides = array<i32>} : memref<8x128xf32, #tpu.memory_space<vmem>>, vector<8x128xf32>,
    return
  }
  func.func @transform_0(%arg0: i32, %arg1: i32) -> (i32, i32) {
    %c0_i32 = arith.constant 0 : i32
    %c0_i32_0 = arith.constant 0 : i32
    return %arg0, %c0_i32 : i32, i32
  }
  func.func @transform_1(%arg0: i32, %arg1: i32) -> (i32, i32) {
    %c0_i32 = arith.constant 0 : i32
    %c0_i32_0 = arith.constant 0 : i32
    return %arg0, %c0_i32 : i32, i32
  }
  func.func @transform_2(%arg0: i32, %arg1: i32) -> (i32, i32) {
    %c0_i32 = arith.constant 0 : i32
    %c0_i32_0 = arith.constant 0 : i32
    return %c0_i32, %arg1 : i32, i32
  }
  func.func @transform_3(%arg0: i32, %arg1: i32) -> (i32, i32) {
    %c0_i32 = arith.constant 0 : i32
    return %arg0, %arg1 : i32, i32
  }
  func.func @transform_4(%arg0: i32, %arg1: i32) -> (i32, i32) {
    %c0_i32 = arith.constant 0 : i32
    return %arg0, %arg1 : i32, i32
  }
}

</mosaic_0001>

<bundles_post_ra>
// kernel: tpu_custom_call.1
= control target key start
LH: loop header
LB: loop body
LE: loop exit
PB: predicated region body
PF: predicated region fallthrough
CT: control target
= control target key end

     0   :  { %v212_v2 = vmov 0   ;;  %s290_s0 = inlined_call_operand.vmem [shape: f32[8,1], index: 0, kind: input, shape index: {}]   ;;  %s291_s1 = inlined_call_operand.vmem [shape: f32[8,1], index: 1, kind: input, shape index: {}]   ;;  %s292_s2 = inlined_call_operand.vmem [shape: f32[1,128], index: 2, kind: input, shape index: {}]   ;;  %s293_s3 = inlined_call_operand.vmem [shape: f32[8,128], index: 3, kind: input, shape index: {}]   ;;  %s294_s4 = inlined_call_operand.hbm [shape: f32[8,128], index: 4, kind: output, shape index: {}]  }
   0x1   :  { %v140_v0 = vld [vmem:[%s291_s1] sm:$0xff]  ;;  %183 = vset.pattern.permute.xlu0 %v212_v2 }
   0x2   :  { %v18_v1 = vld [vmem:[%s290_s0] sm:$0xff]  ;;  %vm141_vm0 = vcmp.gt.f32.partialorder %v140_v0, 0.5 }
   0x3   :  { %22 = vperm.xlu0 %183, %v18_v1   ;;  %v142_v3 = vsel %vm141_vm0, 1, %v212_v2 }
   0x4   :  { %9 = vsyncpa [#allocation3], 0  ;;  %v166_v4 = vld [vmem:[%s292_s2] ss:$0 sm:$0xff]  ;;  %v213_v17 = vmov 683565275  }
   0x5   :  { %v214_v19 = vmov 2475754826   ;;  %v215_v22 = vmov 2131351028   ;;  %v216_v25 = vmov 2102212464  }
   0x6   :  { %v217_v28 = vmov 920167782   ;;  %v218_v31 = vmov 1326507024   ;;  %s219_s2 = smov [#allocation2]  }
   0x7   :  { %144 = vperm.xlu0 %183, %v142_v3   ;;  %s158_s21 = sshll.u32 %s219_s2, 4  ;;  %s159_s21 = int_to_ptr.vmem [resolvable:$true] %s158_s21 }
   0x8   :  { %s188_s22 = scalar_lea.vmem %s159_s21, 128  ;;  %p193_p1 = scmp.lt.s32.totalorder %s159_s21, %s159_s21 }
   0x9   :  { %p189_p0 = scmp.ne.s32.totalorder %s159_s21, %s188_s22  ;;  %p194_p2 = scmp.lt.s32.totalorder %s188_s22, %s188_s22 }
   0xb   :  { %p195_p3 = por %p194_p2, %p193_p1 }
   0xd   :  { %p196_p4 = pnand %p195_p3, %p189_p0 }
  0x82   :  { %v23_v5 = vpop.permute.xlu0 %22 }
  0x83   :  { %v254_v6 = vmul.f32 %v166_v4, %v23_v5 }
  0x85   :  { %v35_v7 = vand.u32 2139095040, %v254_v6  ;;  %v32_v11 = vand.u32 2147483647, %v254_v6  ;;  %vm34_vm8 = vcmp.lt.s32.totalorder %v254_v6, 0  ;;  %vm124_vm13 = vweird.f32 %v254_v6 }
  0x87   :  { %v36_v8 = vshrl.u32 %v35_v7, 23  ;;  %v39_v14 = vand.u32 8388607, %v32_v11  ;;  %vm33_vm9 = vcmp.le.f32.partialorder %v32_v11, 0.7853982 }
  0x89   :  { %v167_v9 = vadd.s32 4294967169, %v36_v8  ;;  %v40_v33 = vor.u32 8388608, %v39_v14 }
  0x8b   :  { %v42_v10 = vadd.s32 1, %v167_v9  ;;  %v80_v47 = vshll.u32 %v40_v33, 8 }
  0x8d   :  { %vm43_vm1 = vcmp.gt.s32.totalorder %v42_v10, 0 }
  0x8e   :  { %v44_v12 = vsel %vm43_vm1, %v42_v10, 0 }
  0x8f   :  { %v46_v13 = vand.u32 31, %v44_v12  ;;  %v45_v16 = vshrl.u32 %v44_v12, 5 }
  0x91   :  { %v47_v15 = vsub.s32 32, %v46_v13  ;;  %v49_v18 = vshll.u32 %v213_v17, %v46_v13  ;;  %v52_v20 = vshll.u32 %v214_v19, %v46_v13  ;;  %v55_v24 = vshll.u32 %v215_v22, %v46_v13 }
  0x92   :  { %v58_v27 = vshll.u32 %v216_v25, %v46_v13  ;;  %v61_v30 = vshll.u32 %v217_v28, %v46_v13  ;;  %vm64_vm2 = vcmp.lt.s32.totalorder %v45_v16, 1  ;;  %vm67_vm3 = vcmp.lt.s32.totalorder %v45_v16, 4 }
  0x93   :  { %v50_v21 = vshrl.u32 %v214_v19, %v47_v15  ;;  %v53_v23 = vshrl.u32 %v215_v22, %v47_v15  ;;  %v56_v26 = vshrl.u32 %v216_v25, %v47_v15  ;;  %v59_v29 = vshrl.u32 %v217_v28, %v47_v15 }
  0x94   :  { %v62_v32 = vshrl.u32 %v218_v31, %v47_v15  ;;  %v48_v42 = vshrl.u32 %v213_v17, %v47_v15  ;;  %vm66_vm4 = vcmp.lt.s32.totalorder %v45_v16, 3  ;;  %vm65_vm5 = vcmp.lt.s32.totalorder %v45_v16, 2 }
  0x95   :  { %v51_v34 = vor.u32 %v50_v21, %v49_v18  ;;  %v54_v35 = vor.u32 %v53_v23, %v52_v20  ;;  %v57_v36 = vor.u32 %v56_v26, %v55_v24  ;;  %v60_v37 = vor.u32 %v59_v29, %v58_v27 }
  0x96   :  { %v63_v38 = vor.u32 %v62_v32, %v61_v30 }
  0x97   :  { %v69_v39 = vsel %vm67_vm3, %v57_v36, 2102212464  ;;  %v72_v40 = vsel %vm64_vm2, %v51_v34, %v54_v35  ;;  %v76_v41 = vsel %vm64_vm2, %v54_v35, %v57_v36  ;;  %v73_v43 = vsel %vm67_vm3, %v60_v37, 920167782 }
  0x98   :  { %v77_v44 = vsel %vm67_vm3, %v63_v38, 1326507024  ;;  %v74_v45 = vsel %vm66_vm4, %v57_v36, %v73_v43  ;;  %v68_v48 = vsel %vm64_vm2, %v48_v42, %v51_v34  ;;  %v70_v49 = vsel %vm66_vm4, %v54_v35, %v69_v39  ;;  %v148_v36 = vld [vmem:[%s293_s3] sm:$0xff]  ;;  %v145_v38 = vpop.permute.xlu0 %144 }
  0x99   :  { %v78_v46 = vsel %vm66_vm4, %v60_v37, %v77_v44  ;;  %v75_v50 = vsel %vm65_vm5, %v72_v40, %v74_v45  ;;  %v71_v56 = vsel %vm65_vm5, %v68_v48, %v70_v49  ;;  %v149_v40 = vmul.f32 2.0, %v148_v36 }
  0x9a   :  { %v79_v51 = vsel %vm65_vm5, %v76_v41, %v78_v46  ;;  %v263_v54 = vmul.u32.u64.low %v80_v47, %v75_v50  ;;  %v264_v55 = vmul.u32.u64.high %v80_v47, %v75_v50, %v263_v54  ;;  %v87_v58 = vmul.u32 %v80_v47, %v71_v56 }
  0x9b   :  { %v260_v52 = vmul.u32.u64.low %v80_v47, %v79_v51  ;;  %v261_v53 = vmul.u32.u64.high %v80_v47, %v79_v51, %v260_v52  ;;  %vm146_vm15 = vcmp.eq.s32.totalorder %v145_v38, 1 }
  0x9c   :  { %v90_v57 = vadd.s32 1, %v264_v55 }
  0x9d   :  { %vm89_vm6 = vc.u32 %v261_v53, %v263_v54  ;;  %v88_v7 = vadd.s32 %v263_v54, %v261_v53 }
  0x9e   :  { %v91_v59 = vsel %vm89_vm6, %v90_v57, %v264_v55 }
  0x9f   :  { %v92_v60 = vadd.s32 %v91_v59, %v87_v58 }
  0xa1   :  { %v93_v61 = vadd.s32 536870912, %v92_v60 }
  0xa3   :  { %v94_v62 = vshrl.u32 %v93_v61, 30 }
  0xa5   :  { %v95_v63 = vshll.u32 %v94_v62, 30  ;;  %v118_v20 = vsub.s32 4, %v94_v62 }
  0xa7   :  { %v96_v0 = vsub.s32 %v92_v60, %v95_v63  ;;  %v119_v23 = vsel %vm34_vm8, %v118_v20, %v94_v62 }
  0xa8   :  { %v121_v25 = vsel %vm33_vm9, 0, %v119_v23 }
  0xa9   :  { %v98_v1 = vsub.s32 0, %v96_v0  ;;  %v125_v26 = vadd.s32 3, %v121_v25 }
  0xab   :  { %v168_v2 = vmin.u32 %v98_v1, %v96_v0  ;;  %v126_v27 = vand.u32 3, %v125_v26 }
  0xad   :  { %v100_v3 = vclz %v168_v2  ;;  %vm131_vm10 = vcmp.eq.s32.totalorder %v126_v27, 2  ;;  %vm128_vm11 = vcmp.eq.s32.totalorder %v126_v27, 0  ;;  %vm127_vm12 = vcmp.lt.s32.totalorder %v126_v27, 2 }
  0xaf   :  { %v169_v4 = vadd.s32 4294967294, %v100_v3 }
  0xb1   :  { %vm170_vm7 = vcmp.lt.s32.totalorder %v169_v4, 0 }
  0xb2   :  { %v103_v5 = vsel %vm170_vm7, 0, %v169_v4 }
  0xb3   :  { %v104_v8 = vsub.s32 32, %v103_v5  ;;  %v108_v9 = vsub.s32 4294967266, %v103_v5  ;;  %v105_v10 = vshll.u32 %v96_v0, %v103_v5 }
  0xb5   :  { %v106_v12 = vshrl.u32 %v88_v7, %v104_v8  ;;  %v109_v13 = vadd.s32 127, %v108_v9 }
  0xb7   :  { %v107_v14 = vor.u32 %v106_v12, %v105_v10  ;;  %v110_v15 = vshll.u32 %v109_v13, 23 }
  0xb9   :  { %v111_v16 = vor.u32 4788187, %v110_v15  ;;  %v114_v18 = vcvt.s32.f32 %v107_v14 }
  0xbb   :  { %v112_v17 = vand.u32 2147483647, %v111_v16 }
  0xbd   :  { %v115_v19 = vmul.f32 %v114_v18, %v112_v17 }
  0xbf   :  { %v116_v21 = vxor.u32 2147483648, %v115_v19 }
  0xc1   :  { %v117_v22 = vsel %vm34_vm8, %v116_v21, %v115_v19 }
  0xc2   :  { %v120_v24 = vsel %vm33_vm9, %v254_v6, %v117_v22 }
  0xc3   :  { %184 = vcosq.f32 %v120_v24 }
  0xc4   :  { %186 = vsinq.f32 %v120_v24 }
  0xcd   :  { %v185_v28 = vpop.eup %184 }
  0xce   :  { %v187_v29 = vpop.eup %186  ;;  %v132_v30 = vxor.u32 2147483648, %v185_v28 }
  0xcf   :  { %v129_v31 = vxor.u32 2147483648, %v187_v29 }
  0xd0   :  { %v133_v32 = vsel %vm131_vm10, %v132_v30, %v187_v29 }
  0xd1   :  { %v130_v33 = vsel %vm128_vm11, %v185_v28, %v129_v31 }
  0xd2   :  { %v134_v11 = vsel %vm127_vm12, %v130_v33, %v133_v32 }
  0xd3   :  { %v135_v34 = vsel %vm124_vm13, nan, %v134_v11 }
  0xd4   :  { %v136_v35 = vmul.f32 500.0, %v135_v34 }
  0xd6   :  { %v137_v37 = vfloor.f32 %v136_v35 }
  0xd8   :  { %v138_v39 = vsub.f32 %v136_v35, %v137_v37 }
  0xda   :  { %vm139_vm14 = vcmp.ge.f32.partialorder %v138_v39, 0.5 }
  0xdb   :  { %vm147_vm0 = vmxor %vm139_vm14, %vm146_vm15 }
  0xdc   :  { %v150_v41 = vsel %vm147_vm0, %v149_v40, 0.0 }
  0xdd   :  { %151 = vst [vmem:[#allocation2] sm:$0xff] %v150_v41 }
  0xde   :  { %199 = shalt.err (!%p196_p4)
}
  0xdf   :  { %s200_s24 = scalar_lea.hbm %s294_s4, 128 }
  0xe0   :  { %p201_p5 = scmp.ne.s32.totalorder %s294_s4, %s200_s24  ;;  %p204_p6 = scmp.lt.u32.totalorder %s200_s24, %s294_s4 }
  0xe2   :  { %p206_p7 = pnand %p204_p6, %p201_p5 }
  0xe4   :  { %209 = shalt.err (!%p206_p7)
}
  0xe5   :  { %161 = dma.vmem_to_hbm [thread:$0]  %s159_s21, 128, %s294_s4, [#allocation3]  }
  0xe6   :  { %210 = dma.done.wait [#allocation3], 128  }
  0xe7   :  { %211 = vsyncadd [#allocation3], 4294967168 }
  0xe8   :  { %165 = vsyncpa [#allocation3], 1 }

</bundles_post_ra>
